<compile_context>
chip_gen: v7x
topology: tpu7x:2x2x1
jax: 0.10.0
libtpu: 0.0.40
codegen_flags: <defaults>
</compile_context>

<pallas_src>
import functools

import jax
import jax.numpy as jnp
from jax import lax
from jax.experimental import pallas as pl
from jax.experimental.pallas import tpu as pltpu

SMOOTH = 1.0

# Per-input per-step block budget. 2 inputs x 2 pipeline buffers x 4 MiB =
# 16 MiB of double-buffered tiles, under the explicit 32 MiB scoped-VMEM limit
# set below (safe on v5e/v6e/v7x).
_BLOCK_BUDGET_BYTES = 4 * 1024 * 1024
_VMEM_LIMIT_BYTES = 32 * 1024 * 1024

# Sublane multiple required for unmasked packed loads, keyed by itemsize.
_SUBLANE_MULT = {4: 8, 2: 16, 1: 32}


def _fold_hw(h, w):
    """Fold the flattened spatial extent H*W into (rows, lanes).

    Prefer a 128-wide lane dim (dense vregs for any H, W with H*W % 128 == 0).
    """
    hw = h * w
    if hw % 128 == 0:
        return hw // 128, 128
    # TODO(synk): H*W not divisible by 128 falls back to the natural (H, W)
    # folding (lane dim = W, possibly <128-dense); a padded copy or Element
    # slicing could make this lane-dense too.
    return h, w


def _pick_tiles(n, r, lane, itemsizes, budget=_BLOCK_BUDGET_BYTES):
    """Choose (bn, br) batch/row block sizes.

    br is a multiple of the dtype sublane packing (or the full row extent when
    smaller); bn is whatever still fits the per-input budget.  Neither has to
    divide the array dims (cdiv grid + masked tails handle the remainder).
    """
    sub = max(_SUBLANE_MULT.get(s, 8) for s in itemsizes)
    row_bytes = lane * max(itemsizes)
    max_rows = max(sub, (budget // max(1, row_bytes)) // sub * sub)
    if r <= sub:
        br = r  # full dim -> always a legal block shape
    else:
        br = max(sub, (min(r, max_rows) // sub) * sub)
    bn = max(1, min(n, budget // max(1, br * row_bytes)))
    # Keep at least two batch blocks whenever possible so the leading
    # "parallel" grid axis can be split across v7x's two TensorCores.
    if n >= 2:
        bn = min(bn, (n + 1) // 2)
    return bn, br


def _dsc_kernel(p_ref, t_ref, up_ref, bot_ref, *, n, r, bn, br, lane):
    """Streaming Dice partial sums for one (batch-block, row-block) tile.

    up_ref[i]  accumulates per-lane  sum((1 - p) * p * t)
    bot_ref[i] accumulates per-lane  sum((1 - p) * p + t)
    for batch block i; the scalar combine happens in the JAX epilogue.
    """
    i = pl.program_id(0)
    j = pl.program_id(1)

    @pl.when(j == 0)
    def _():
        up_ref[...] = jnp.zeros_like(up_ref)
        bot_ref[...] = jnp.zeros_like(bot_ref)

    # Stream in native dtype; cast in-kernel (VPU work hidden under the DMA).
    p = p_ref[...].astype(jnp.float32)
    t = t_ref[...].astype(jnp.float32)

    # Zero contributions from rows/batches past the array edge.  Only emitted
    # (trace-time check) when the cdiv grid actually has partial tail blocks.
    if (n % bn) or (r % br):
        rem_n = n - i * bn
        rem_r = r - j * br
        b_idx = lax.broadcasted_iota(jnp.int32, (bn, br, lane), 0)
        r_idx = lax.broadcasted_iota(jnp.int32, (bn, br, lane), 1)
        valid = (b_idx < rem_n) & (r_idx < rem_r)
        p = jnp.where(valid, p, 0.0)
        t = jnp.where(valid, t, 0.0)

    q = (1.0 - p) * p
    # Per-lane partial sums only: no per-step cross-lane tree / scalar RMW.
    up_ref[...] += jnp.sum(q * t, axis=(0, 1), keepdims=True)
    bot_ref[...] += jnp.sum(q + t, axis=(0, 1), keepdims=True)


def dsc_loss(predictions, targets, smooth=SMOOTH):
    """Pallas implementation of DSC.forward(predictions, targets).

    predictions: [N, C, H, W] (channel 1 is used), any float dtype.
    targets:     [N, H, W], any numeric dtype.
    """
    n, c, h, w = predictions.shape
    assert c >= 2, "DSC uses predictions[:, 1]; need at least 2 channels"
    assert targets.shape == (n, h, w), "targets must be [N, H, W]"

    r, lane = _fold_hw(h, w)
    # Free reshapes of contiguous arrays (metadata only, no HBM round trip);
    # channel 1 is still selected inside the kernel's BlockSpec.
    preds = predictions.reshape(n, c, r, lane)
    targs = targets.reshape(n, r, lane)

    p_isize = jnp.dtype(predictions.dtype).itemsize
    t_isize = jnp.dtype(targets.dtype).itemsize
    bn, br = _pick_tiles(n, r, lane, (p_isize, t_isize))
    gn = -(-n // bn)
    gr = -(-r // br)

    n_elem = n * h * w
    cost = pl.CostEstimate(
        flops=6 * n_elem,
        transcendentals=0,
        bytes_accessed=n_elem * (p_isize + t_isize) + 2 * gn * lane * 4,
    )

    kernel = functools.partial(_dsc_kernel, n=n, r=r, bn=bn, br=br, lane=lane)
    up_parts, bot_parts = pl.pallas_call(
        kernel,
        out_shape=(
            jax.ShapeDtypeStruct((gn, 1, lane), jnp.float32),
            jax.ShapeDtypeStruct((gn, 1, lane), jnp.float32),
        ),
        grid_spec=pltpu.PrefetchScalarGridSpec(
            num_scalar_prefetch=0,
            grid=(gn, gr),
            in_specs=[
                # Channel 1 selected here: size-1 (squeezed) C dim with its
                # block index fixed to 1 -> only channel-1 bytes are DMA'd,
                # and each batch element's (br, lane) slab is one contiguous
                # DMA chunk.
                pl.BlockSpec((bn, None, br, lane), lambda i, j: (i, 1, j, 0)),
                pl.BlockSpec((bn, br, lane), lambda i, j: (i, j, 0)),
            ],
            out_specs=(
                pl.BlockSpec((1, 1, lane), lambda i, j: (i, 0, 0)),
                pl.BlockSpec((1, 1, lane), lambda i, j: (i, 0, 0)),
            ),
        ),
        compiler_params=pltpu.CompilerParams(
            # Batch-block axis is truly independent (per-block outputs), so it
            # can be split across v7x's two TensorCores; row axis accumulates.
            dimension_semantics=("parallel", "arbitrary"),
            vmem_limit_bytes=_VMEM_LIMIT_BYTES,
        ),
        cost_estimate=cost,
    )(preds, targs)

    # Tiny JAX epilogue: combine per-batch-block per-lane partials.
    dice_up = jnp.sum(up_parts) + smooth
    dice_bot = jnp.sum(bot_parts) + smooth
    return 1.0 - dice_up / dice_bot


def _dsc_reference(predictions, targets, smooth=SMOOTH):
    """Pure-JAX reference matching the PyTorch module exactly."""
    inputs = predictions[:, 1]
    input_flat = inputs.reshape(-1).astype(jnp.float32)
    target_flat = targets.reshape(-1).astype(jnp.float32)
    mult = input_flat * target_flat
    dice_upper = ((1.0 - input_flat) * mult).sum() + smooth
    dice_bottom = ((1.0 - input_flat) * input_flat).sum() + target_flat.sum() + smooth
    return 1.0 - dice_upper / dice_bottom


if __name__ == "__main__":
    key = jax.random.PRNGKey(0)
    kp, kt = jax.random.split(key)

    N, C, H, W = 2, 4, 16, 16
    # Softmax-like predictions in [0, 1]; binary float targets.
    logits = jax.random.normal(kp, (N, C, H, W), dtype=jnp.float32)
    predictions = jax.nn.softmax(logits, axis=1)
    targets = (jax.random.uniform(kt, (N, H, W)) > 0.5).astype(jnp.float32)

    loss = jax.block_until_ready(dsc_loss(predictions, targets))
    ref = jax.block_until_ready(_dsc_reference(predictions, targets))

    assert jnp.allclose(loss, ref, atol=1e-5, rtol=1e-5), (loss, ref)
    print("KERNEL_OK")
</pallas_src>

<mosaic_0001>
module attributes {stable_mosaic.version = 11 : i64} {
  func.func @_dsc_kernel(%arg0: i32, %arg1: i32, %arg2: memref<1x1x2x128xf32, #tpu.memory_space<vmem>>, %arg3: memref<1x2x128xf32, #tpu.memory_space<vmem>>, %arg4: memref<1x1x128xf32, #tpu.memory_space<vmem>>, %arg5: memref<1x1x128xf32, #tpu.memory_space<vmem>>) attributes {dimension_semantics = [#tpu.dimension_semantics<parallel>, #tpu.dimension_semantics<arbitrary>], iteration_bounds = array<i64: 2, 1>, scalar_prefetch = 0 : i64, scratch_operands = 0 : i64, tpu.core_type = #tpu.core_type<tc>, window_params = [{transform_indices = @transform_0, window_bounds = array<i64: 1, 1, 2, 128>}, {transform_indices = @transform_1, window_bounds = array<i64: 1, 2, 128>}, {transform_indices = @transform_2, window_bounds = array<i64: 1, 1, 128>}, {transform_indices = @transform_3, window_bounds = array<i64: 1, 1, 128>}]} {
    %c0_i32 = arith.constant 0 : i32
    %0 = arith.cmpi eq, %arg1, %c0_i32 : i32
    %1 = arith.extui %0 : i1 to i32
    %c0_i32_0 = arith.constant 0 : i32
    %2 = arith.cmpi ne, %1, %c0_i32_0 : i32
    scf.if %2 {
      %cst_21 = arith.constant 0.000000e+00 : f32
      %21 = vector.broadcast %cst_21 : f32 to vector<1x1x128xf32>
      %c0_22 = arith.constant 0 : index
      %c0_23 = arith.constant 0 : index
      %c0_24 = arith.constant 0 : index
      %22 = vector.load %arg4[%c0_22, %c0_23, %c0_24] : memref<1x1x128xf32, #tpu.memory_space<vmem>>, vector<1x1x128xf32>
      tpu.vector_store %arg4[%c0_22, %c0_23, %c0_24], %21 {strides = array<i32>} : memref<1x1x128xf32, #tpu.memory_space<vmem>>, vector<1x1x128xf32>,
      %cst_25 = arith.constant 0.000000e+00 : f32
      %23 = vector.broadcast %cst_25 : f32 to vector<1x1x128xf32>
      %c0_26 = arith.constant 0 : index
      %c0_27 = arith.constant 0 : index
      %c0_28 = arith.constant 0 : index
      %24 = vector.load %arg5[%c0_26, %c0_27, %c0_28] : memref<1x1x128xf32, #tpu.memory_space<vmem>>, vector<1x1x128xf32>
      tpu.vector_store %arg5[%c0_26, %c0_27, %c0_28], %23 {strides = array<i32>} : memref<1x1x128xf32, #tpu.memory_space<vmem>>, vector<1x1x128xf32>,
    } else {
    }
    %c0 = arith.constant 0 : index
    %c0_1 = arith.constant 0 : index
    %c0_2 = arith.constant 0 : index
    %c0_3 = arith.constant 0 : index
    %3 = vector.load %arg2[%c0, %c0_1, %c0_2, %c0_3] : memref<1x1x2x128xf32, #tpu.memory_space<vmem>>, vector<1x1x2x128xf32>
    %4 = vector.shape_cast %3 : vector<1x1x2x128xf32> to vector<1x2x128xf32>
    %c0_4 = arith.constant 0 : index
    %c0_5 = arith.constant 0 : index
    %c0_6 = arith.constant 0 : index
    %5 = vector.load %arg3[%c0_4, %c0_5, %c0_6] : memref<1x2x128xf32, #tpu.memory_space<vmem>>, vector<1x2x128xf32>
    %cst = arith.constant 1.000000e+00 : f32
    %6 = vector.broadcast %cst : f32 to vector<1x2x128xf32>
    %7 = arith.subf %6, %4 : vector<1x2x128xf32>
    %8 = arith.mulf %7, %4 : vector<1x2x128xf32>
    %c0_7 = arith.constant 0 : index
    %c0_8 = arith.constant 0 : index
    %c0_9 = arith.constant 0 : index
    %9 = vector.load %arg4[%c0_7, %c0_8, %c0_9] : memref<1x1x128xf32, #tpu.memory_space<vmem>>, vector<1x1x128xf32>
    %10 = arith.mulf %8, %5 : vector<1x2x128xf32>
    %cst_10 = arith.constant dense<0.000000e+00> : vector<128xf32>
    %11 = vector.multi_reduction <add>, %10, %cst_10 [0, 1] : vector<1x2x128xf32> to vector<128xf32>
    %12 = vector.shape_cast %11 : vector<128xf32> to vector<1x1x128xf32>
    %13 = arith.addf %9, %12 : vector<1x1x128xf32>
    %c0_11 = arith.constant 0 : index
    %c0_12 = arith.constant 0 : index
    %c0_13 = arith.constant 0 : index
    %14 = vector.load %arg4[%c0_11, %c0_12, %c0_13] : memref<1x1x128xf32, #tpu.memory_space<vmem>>, vector<1x1x128xf32>
    tpu.vector_store %arg4[%c0_11, %c0_12, %c0_13], %13 {strides = array<i32>} : memref<1x1x128xf32, #tpu.memory_space<vmem>>, vector<1x1x128xf32>,
    %c0_14 = arith.constant 0 : index
    %c0_15 = arith.constant 0 : index
    %c0_16 = arith.constant 0 : index
    %15 = vector.load %arg5[%c0_14, %c0_15, %c0_16] : memref<1x1x128xf32, #tpu.memory_space<vmem>>, vector<1x1x128xf32>
    %16 = arith.addf %8, %5 : vector<1x2x128xf32>
    %cst_17 = arith.constant dense<0.000000e+00> : vector<128xf32>
    %17 = vector.multi_reduction <add>, %16, %cst_17 [0, 1] : vector<1x2x128xf32> to vector<128xf32>
    %18 = vector.shape_cast %17 : vector<128xf32> to vector<1x1x128xf32>
    %19 = arith.addf %15, %18 : vector<1x1x128xf32>
    %c0_18 = arith.constant 0 : index
    %c0_19 = arith.constant 0 : index
    %c0_20 = arith.constant 0 : index
    %20 = vector.load %arg5[%c0_18, %c0_19, %c0_20] : memref<1x1x128xf32, #tpu.memory_space<vmem>>, vector<1x1x128xf32>
    tpu.vector_store %arg5[%c0_18, %c0_19, %c0_20], %19 {strides = array<i32>} : memref<1x1x128xf32, #tpu.memory_space<vmem>>, vector<1x1x128xf32>,
    return
  }
  func.func @transform_0(%arg0: i32, %arg1: i32) -> (i32, i32, i32, i32) {
    %c1_i32 = arith.constant 1 : i32
    %c0_i32 = arith.constant 0 : i32
    %c0_i32_0 = arith.constant 0 : i32
    return %arg0, %c1_i32, %arg1, %c0_i32 : i32, i32, i32, i32
  }
  func.func @transform_1(%arg0: i32, %arg1: i32) -> (i32, i32, i32) {
    %c0_i32 = arith.constant 0 : i32
    %c0_i32_0 = arith.constant 0 : i32
    return %arg0, %arg1, %c0_i32 : i32, i32, i32
  }
  func.func @transform_2(%arg0: i32, %arg1: i32) -> (i32, i32, i32) {
    %c0_i32 = arith.constant 0 : i32
    %c0_i32_0 = arith.constant 0 : i32
    %c0_i32_1 = arith.constant 0 : i32
    return %arg0, %c0_i32, %c0_i32_0 : i32, i32, i32
  }
  func.func @transform_3(%arg0: i32, %arg1: i32) -> (i32, i32, i32) {
    %c0_i32 = arith.constant 0 : i32
    %c0_i32_0 = arith.constant 0 : i32
    %c0_i32_1 = arith.constant 0 : i32
    return %arg0, %c0_i32, %c0_i32_0 : i32, i32, i32
  }
}

</mosaic_0001>

<bundles_post_ra>
// kernel: tpu_custom_call.1
= control target key start
LH: loop header
LB: loop body
LE: loop exit
PB: predicated region body
PF: predicated region fallthrough
CT: control target
= control target key end

     0   :  { %9 = vsyncpa [#allocation3], 0  ;;  %s999_s0 = inlined_call_operand.hbm [shape: f32[2,4,2,128], index: 0, kind: input, shape index: {}]   ;;  %s1000_s1 = inlined_call_operand.hbm [shape: f32[2,2,128], index: 1, kind: input, shape index: {}]   ;;  %s1001_s2 = inlined_call_operand.hbm [shape: f32[2,1,128], index: 2, kind: output, shape index: {0}]   ;;  %s1002_s3 = inlined_call_operand.hbm [shape: f32[2,1,128], index: 3, kind: output, shape index: {1}]  }
   0x1   :  { %11 = vsyncpa [#allocation3 + $0x1], 0 }
   0x2   :  { %12 = vsyncpa [#allocation6], 0 }
   0x3   :  { %14 = vsyncpa [#allocation6 + $0x1], 0 }
   0x4   :  { %15 = vsyncpa [#allocation4], 0 }
   0x5   :  { %17 = vsyncpa [#allocation4 + $0x1], 0 }
   0x6   :  { %18 = vsyncpa [#allocation9], 0 }
   0x7   :  { %20 = vsyncpa [#allocation9 + $0x1], 0  ;;  %s740_s12 = smov 0   ;;  %s742_s13 = smov 0  }
   0x8   :  { %s744_s14 = smov 0   ;;  %s746_s15 = smov 0  }
   0x9   :  { %s748_s16 = smov 0   ;;  %s750_s17 = smov 0  }
   0xa LB: > { %s444_s18 = sadd.s32 4294967295, %s713_s17   ;;  %s445_s19 = sadd.s32 4294967294, %s713_s17   ;;  %s713_s17 = sphi %s750_s17, %s26_s17   ;;  %s709_s16 = sphi %s748_s16, %s1022_s16   ;;  %s705_s15 = sphi %s746_s15, %s1021_s15   ;;  %s701_s14 = sphi %s744_s14, %s1020_s14   ;;  %s697_s13 = sphi %s742_s13, %s1019_s13   ;;  %s693_s12 = sphi %s740_s12, %s1018_s12  }
   0xb   : > { %s38_s20 = sadd.s32 1, %s709_s16  ;;  %s47_s21 = sadd.s32 1, %s701_s14 }
   0xc   : > { %p40_p0 = scmp.ge.s32.totalorder %s38_s20, 2  ;;  %p54_p1 = scmp.ne.s32.totalorder %s701_s14, %s697_s13 }
   0xd   : > { %p55_p2 = scmp.eq.s32.totalorder %s713_s17, 0  ;;  %p60_p3 = scmp.ne.s32.totalorder %s697_s13, %s693_s12 }
   0xe   : > { %s1024_s20 = smov (%p40_p0, %s38_s20), 0  ;;  %p61_p5 = scmp.eq.s32.totalorder %s444_s18, 0 }
   0xf   : > { %p781_p4 = por %p55_p2, %p54_p1  ;;  %s42_s23 = ssub.s32 %s709_s16, %s1024_s20 }
  0x10   : > { %p112_p6 = scmp.eq.s32.totalorder %s444_s18, 1  ;;  %p45_p7 = scmp.eq.s32.totalorder %s42_s23, 0 }
  0x11   : > { %p787_p8 = por %p61_p5, %p60_p3  ;;  %p118_p10 = scmp.eq.s32.totalorder %s445_s19, 1 }
  0x12   : > { %p791_p9 = por %p112_p6, %p54_p1  ;;  %p483_p13 = scmp.lt.s32.totalorder %s713_s17, 2 }
  0x13   : > { %s1006_s24 = scalar_select %p787_p8, 1, 0 }
  0x14   : > { %s1007_s25 = scalar_select %p791_p9, 1, 0 }
  0x15   : > { %s796_s26 = scalar_select %p45_p7, %s701_s14, %s47_s21  }
  0x16   : > { %p798_p11 = por %p118_p10, %p60_p3  ;;  %s805_s28 = sand.u32 1, %s701_s14  }
  0x17   : > { %s448_s29 = sshll.u32 %s805_s28, 1  ;;  %s460_s30 = sshll.u32 %s709_s16, 7 }
  0x18   : > { %s1008_s27 = scalar_select %p798_p11, 1, 0 }
  0x19   : > { %s358_s6 = scalar_lea.hbm %s999_s0, %s460_s30  ;;  %s168_s7 = scalar_lea.vmem [#allocation2], %s448_s29 }
  0x1a   : > { %s178_s8 = sshll.u32 %s168_s7, 4  ;;  %s814_s9 = scalar_lea.hbm %s358_s6, 32  ;;  %s816_s8 = int_to_ptr.vmem [resolvable:$true] %s178_s8 }
  0x1b   : > { %p820_p0 = pnand %p483_p13, %p781_p4  ;;  %s165_s11 = scalar_lea.sflag [#allocation3], %s805_s28 }
  0x1c   : > { %s564_s18 = scalar_lea.hbm %s358_s6, 64  ;;  %s539_s22 = scalar_lea.hbm %s999_s0, 256 }
  0x1d   : > { %p535_p3 = scmp.ne.s32.totalorder %s814_s9, %s564_s18  ;;  %p536_p5 = pneg %p820_p0 }
  0x1e   : > { %p540_p4 = scmp.lt.u32.totalorder %s814_s9, %s999_s0  ;;  %p541_p10 = scmp.lt.u32.totalorder %s539_s22, %s564_s18 }
  0x1f   : > { %p537_p6 = pnand %p536_p5, %p535_p3  ;;  %p543_p12 = scmp.lt.u32.totalorder %s564_s18, %s814_s9 }
  0x20   : > { %p542_p13 = por %p541_p10, %p540_p4 }
  0x21   : > { %p538_p7 = pneg %p537_p6 }
  0x22   : > { %p544_p1 = por %p543_p12, %p542_p13 }
  0x24   : > { %p545_p2 = pnand %p544_p1, %p538_p7 }
  0x26   : > { %548 = shalt.err (!%p545_p2)
}
  0x27   : > { %s549_s4 = scalar_lea.vmem %s816_s8, 32  ;;  %s715_s5 = smov [#allocation2]  }
  0x28   : > { %p550_p3 = scmp.ne.s32.totalorder %s816_s8, %s549_s4  ;;  %s554_s6 = sshll.u32 %s715_s5, 4  ;;  %s555_s6 = int_to_ptr.vmem [resolvable:$false] %s554_s6 }
  0x29   : > { %s556_s7 = scalar_lea.vmem %s555_s6, 64  ;;  %p557_p9 = scmp.lt.s32.totalorder %s816_s8, %s555_s6 }
  0x2a   : > { %p552_p6 = pnand %p550_p3, %p536_p5  ;;  %p558_p4 = scmp.lt.s32.totalorder %s556_s7, %s549_s4 }
  0x2c   : > { %p553_p11 = pneg %p552_p6  ;;  %p559_p10 = por %p558_p4, %p557_p9 }
  0x2e   : > { %p560_p12 = pnand %p559_p10, %p553_p11 }
  0x30   : > { %563 = shalt.err (!%p560_p12)
}
  0x31   : > { %472 = dma.hbm_to_vmem [thread:$0]  (!%p820_p0), %s814_s9, 32, %s816_s8, %s165_s11  }
  0x32   : > { %p1010_p1 = scmp.lt.s32.totalorder %s713_s17, 3  ;;  %p1011_p2 = scmp.ge.s32.totalorder %s713_s17, 1 }
  0x33   : > { %s452_s19 = sshll.u32 %s709_s16, 5  ;;  %s189_s30 = scalar_lea.vmem [#allocation5], %s448_s29 }
  0x34   : > { %p855_p7 = pnand %p1011_p2, %p1010_p1  ;;  %s863_s23 = scalar_lea.hbm %s1000_s1, %s452_s19 }
  0x35   : > { %s197_s4 = sshll.u32 %s189_s30, 4  ;;  %s186_s8 = scalar_lea.sflag [#allocation6], %s805_s28  ;;  %s198_s4 = int_to_ptr.vmem [resolvable:$true] %s197_s4 }
  0x36   : > { %s1012_s18 = scalar_select %p855_p7, 1, 0 }
  0x37   : > { %s565_s9 = scalar_lea.hbm %s863_s23, 32  ;;  %s570_s6 = scalar_lea.hbm %s1000_s1, 64 }
  0x38   : > { %p566_p9 = scmp.ne.s32.totalorder %s863_s23, %s565_s9  ;;  %p571_p3 = scmp.lt.u32.totalorder %s863_s23, %s1000_s1 }
  0x39   : > { %p572_p6 = scmp.lt.u32.totalorder %s570_s6, %s565_s9  ;;  %p574_p10 = scmp.lt.u32.totalorder %s565_s9, %s863_s23 }
  0x3a   : > { %p568_p11 = pnand %p566_p9, %p536_p5 }
  0x3b   : > { %p573_p4 = por %p572_p6, %p571_p3 }
  0x3c   : > { %p569_p13 = pneg %p568_p11 }
  0x3d   : > { %p575_p12 = por %p574_p10, %p573_p4 }
  0x3f   : > { %p576_p1 = pnand %p575_p12, %p569_p13 }
  0x41   : > { %579 = shalt.err (!%p576_p1)
}
  0x42   : > { %s580_s28 = scalar_lea.vmem %s198_s4, 32  ;;  %s716_s29 = smov [#allocation5]  }
  0x43   : > { %p581_p2 = scmp.ne.s32.totalorder %s198_s4, %s580_s28  ;;  %s585_s21 = sshll.u32 %s716_s29, 4  ;;  %s586_s21 = int_to_ptr.vmem [resolvable:$false] %s585_s21 }
  0x44   : > { %s587_s22 = scalar_lea.vmem %s586_s21, 64  ;;  %p588_p8 = scmp.lt.s32.totalorder %s198_s4, %s586_s21 }
  0x45   : > { %p583_p9 = pnand %p581_p2, %p536_p5  ;;  %p589_p7 = scmp.lt.s32.totalorder %s587_s22, %s580_s28 }
  0x47   : > { %p584_p11 = pneg %p583_p9  ;;  %p590_p3 = por %p589_p7, %p588_p8 }
  0x49   : > { %p591_p6 = pnand %p590_p3, %p584_p11 }
  0x4b   : > { %594 = shalt.err (!%p591_p6)
}
  0x4c   : > { %475 = dma.hbm_to_vmem [thread:$0]  (!%p820_p0), %s863_s23, 32, %s198_s4, %s186_s8  }
  0x4d   : > { %p1013_p13 = scmp.ne.s32.totalorder %s1012_s18, 0 }
  0x4e   : > { %s890_s30 = sand.u32 (!%p1013_p13), 1, %s697_s13   ;;  %p1014_p5 = scmp.ne.s32.totalorder (!%p1013_p13), %s1006_s24, 0 }
  0x4f   : > { %206 = sbr.rel (%p1013_p13) target bundleno = 148 (0x94), region = 28  ;;  %s454_s9 = sshll.u32 (!%p1013_p13), %s890_s30, 1 }
  0x50   : > { %s209_s11 = scalar_lea.sflag (!%p1013_p13), [#allocation3], %s890_s30  ;;  %s212_s5 = scalar_lea.vmem (!%p1013_p13), [#allocation2], %s454_s9 }
  0x56   : > { %676 = dma.done.wait (%p1014_p5), %s209_s11, 32  }
  0x57   : > { %678 = vsyncadd (%p1014_p5), %s209_s11, 4294967264  ;;  %s218_s10 = scalar_lea.sflag [#allocation6], %s890_s30  ;;  %s221_s23 = scalar_lea.vmem [#allocation5], %s454_s9 }
  0x58   : > { %680 = dma.done.wait (%p1014_p5), %s218_s10, 32  }
  0x59   : > { %682 = vsyncadd (%p1014_p5), %s218_s10, 4294967264  ;;  %s904_s18 = scalar_lea.vmem [#allocation7], %s890_s30  ;;  %v717_v0 = vmov 0.0   ;;  %s908_s4 = scalar_lea.vmem [#allocation8], %s890_s30  ;;  %v258_v1 = vld [vmem:[%s212_s5] sm:$0x3] }
  0x5a   : > { %256 = vst [vmem:[%s904_s18] sm:$0x1] %v717_v0  ;;  %257 = vst [vmem:[%s908_s4] sm:$0x1] %v717_v0  ;;  %v260_v2 = vsub.f32 1.0, %v258_v1  ;;  %v259_v3 = vld [vmem:[%s221_s23] sm:$0x3]  ;;  %vm264_vm0 = vcmask 1041408  }
  0x5b   : > { %s456_s24 = sshll.u32 %s705_s15, 4  ;;  %s302_s8 = sshll.u32 %s904_s18, 4  ;;  %s921_s8 = int_to_ptr.vmem [resolvable:$true] %s302_s8 }
  0x5c   : > { %v261_v4 = vmul.f32 %v260_v2, %v258_v1  ;;  %s315_s6 = sshll.u32 %s908_s4, 4  ;;  %s919_s28 = scalar_lea.hbm %s1001_s2, %s456_s24  ;;  %s928_s6 = int_to_ptr.vmem [resolvable:$true] %s315_s6 }
  0x5d   : > { %s926_s15 = scalar_lea.hbm %s1002_s3, %s456_s24  ;;  %s286_s22 = scalar_lea.sflag [#allocation4], %s890_s30 }
  0x5e   : > { %v263_v5 = vmul.f32 %v261_v4, %v259_v3  ;;  %v275_v6 = vadd.f32 %v261_v4, %v259_v3  ;;  %s595_s9 = scalar_lea.vmem %s921_s8, 16  ;;  %p1015_p0 = scmp.ne.s32.totalorder %s1007_s25, 0 }
  0x5f   : > { %p596_p8 = scmp.ne.s32.totalorder %s921_s8, %s595_s9  ;;  %s718_s11 = smov [#allocation7]  }
  0x60   : > { %v265_v7 = vsel %vm264_vm0, %v263_v5, 0.0  ;;  %v276_v8 = vsel %vm264_vm0, %v275_v6, 0.0  ;;  %s599_s5 = sshll.u32 %s718_s11, 4  ;;  %s600_s5 = int_to_ptr.vmem [resolvable:$false] %s599_s5 }
  0x61   : > { %v266_v9 = vrot.slane %v265_v7, 4  ;;  %v277_v10 = vrot.slane %v276_v8, 4  ;;  %v262_v19 = vld [vmem:[%s904_s18] sm:$0x1]  ;;  %p597_p7 = pnand %p596_p8, %p1015_p0  ;;  %s601_s10 = scalar_lea.vmem %s600_s5, 32 }
  0x62   : > { %v274_v20 = vld [vmem:[%s908_s4] sm:$0x1]  ;;  %p602_p10 = scmp.lt.s32.totalorder %s921_s8, %s600_s5  ;;  %p603_p12 = scmp.lt.s32.totalorder %s601_s10, %s595_s9 }
  0x63   : > { %v267_v11 = vadd.f32 %v266_v9, %v265_v7  ;;  %v278_v12 = vadd.f32 %v277_v10, %v276_v8  ;;  %p598_p4 = pneg %p597_p7 }
  0x64   : > { %p604_p1 = por %p603_p12, %p602_p10 }
  0x65   : > { %v268_v13 = vrot.slane %v267_v11, 2  ;;  %v279_v14 = vrot.slane %v278_v12, 2 }
  0x66   : > { %p605_p2 = pnand %p604_p1, %p598_p4 }
  0x67   : > { %v269_v15 = vadd.f32 %v268_v13, %v267_v11  ;;  %v280_v16 = vadd.f32 %v279_v14, %v278_v12 }
  0x69   : > { %v270_v17 = vrot.slane %v269_v15, 1  ;;  %v281_v18 = vrot.slane %v280_v16, 1 }
  0x6b   : > { %v271_v21 = vadd.f32 %v270_v17, %v269_v15  ;;  %v282_v22 = vadd.f32 %v281_v18, %v280_v16 }
  0x6d   : > { %v272_v23 = vadd.f32 %v271_v21, %v262_v19  ;;  %v283_v24 = vadd.f32 %v282_v22, %v274_v20 }
  0x6f   : > { %273 = vst [vmem:[%s904_s18] sm:$0x1] %v272_v23  ;;  %284 = vst [vmem:[%s908_s4] sm:$0x1] %v283_v24 }
  0x70   : > { %608 = shalt.err (!%p605_p2)
}
  0x71   : > { %s609_s23 = scalar_lea.hbm %s919_s28, 16  ;;  %s613_s24 = scalar_lea.hbm %s1001_s2, 32 }
  0x72   : > { %p610_p9 = scmp.ne.s32.totalorder %s919_s28, %s609_s23  ;;  %p614_p6 = scmp.lt.u32.totalorder %s919_s28, %s1001_s2 }
  0x73   : > { %p615_p13 = scmp.lt.u32.totalorder %s613_s24, %s609_s23  ;;  %p617_p8 = scmp.lt.u32.totalorder %s609_s23, %s919_s28 }
  0x74   : > { %p611_p11 = pnand %p610_p9, %p1015_p0 }
  0x75   : > { %p616_p5 = por %p615_p13, %p614_p6 }
  0x76   : > { %p612_p3 = pneg %p611_p11 }
  0x77   : > { %p618_p7 = por %p617_p8, %p616_p5 }
  0x79   : > { %p619_p4 = pnand %p618_p7, %p612_p3 }
  0x7b   : > { %622 = shalt.err (!%p619_p4)
}
  0x7c   : > { %465 = dma.vmem_to_hbm [thread:$0]  (%p1015_p0), %s921_s8, 16, %s919_s28, %s286_s22  }
  0x7d   : > { %s290_s29 = scalar_lea.sflag [#allocation9], %s890_s30  ;;  %s623_s21 = scalar_lea.vmem %s928_s6, 16 }
  0x7e   : > { %p624_p10 = scmp.ne.s32.totalorder %s928_s6, %s623_s21  ;;  %s719_s9 = smov [#allocation8]  }
  0x7f   : > { %s627_s11 = sshll.u32 %s719_s9, 4  ;;  %s628_s11 = int_to_ptr.vmem [resolvable:$false] %s627_s11 }
  0x80   : > { %p625_p12 = pnand %p624_p10, %p1015_p0  ;;  %s629_s5 = scalar_lea.vmem %s628_s11, 32 }
  0x81   : > { %p630_p2 = scmp.lt.s32.totalorder %s928_s6, %s628_s11  ;;  %p631_p9 = scmp.lt.s32.totalorder %s629_s5, %s623_s21 }
  0x82   : > { %p626_p1 = pneg %p625_p12 }
  0x83   : > { %p632_p11 = por %p631_p9, %p630_p2 }
  0x85   : > { %p633_p3 = pnand %p632_p11, %p626_p1 }
  0x87   : > { %636 = shalt.err (!%p633_p3)
}
  0x88   : > { %s637_s30 = scalar_lea.hbm %s926_s15, 16  ;;  %s641_s22 = scalar_lea.hbm %s1002_s3, 32 }
  0x89   : > { %p638_p6 = scmp.ne.s32.totalorder %s926_s15, %s637_s30  ;;  %p642_p8 = scmp.lt.u32.totalorder %s926_s15, %s1002_s3 }
  0x8a   : > { %p643_p7 = scmp.lt.u32.totalorder %s641_s22, %s637_s30  ;;  %p645_p10 = scmp.lt.u32.totalorder %s637_s30, %s926_s15 }
  0x8b   : > { %p639_p13 = pnand %p638_p6, %p1015_p0 }
  0x8c   : > { %p644_p4 = por %p643_p7, %p642_p8 }
  0x8d   : > { %p640_p5 = pneg %p639_p13 }
  0x8e   : > { %p646_p12 = por %p645_p10, %p644_p4 }
  0x90   : > { %p647_p1 = pnand %p646_p12, %p640_p5 }
  0x92   : > { %650 = shalt.err (!%p647_p1)
}
  0x93   : > { %466 = dma.vmem_to_hbm [thread:$0]  (%p1015_p0), %s928_s6, 16, %s926_s15, %s290_s29  }
  0x94 PF: > { %s327_s18 = sand.u32 1, %s693_s12   ;;  %p1016_p2 = scmp.ne.s32.totalorder %s1008_s27, 0 }
  0x95   : > { %p1017_p9 = scmp.ge.s32.totalorder %s713_s17, 2  ;;  %s328_s4 = scalar_lea.sflag [#allocation4], %s327_s18 }
  0x97   : > { %p477_p11 = pnand %p1017_p9, %p1016_p2 }
  0x99   : > { %684 = dma.done.wait (!%p477_p11), %s328_s4, 16  }
  0x9a   : > { %686 = vsyncadd (!%p477_p11), %s328_s4, 4294967280  ;;  %s336_s24 = scalar_lea.sflag [#allocation9], %s327_s18 }
  0x9b   : > { %688 = dma.done.wait (!%p477_p11), %s336_s24, 16  }
  0x9c   : > { %690 = vsyncadd (!%p477_p11), %s336_s24, 4294967280  ;;  %s26_s17 = sadd.s32 1, %s713_s17   ;;  %s1018_s12 = smov %s697_s13 }
  0x9d   : > { %p23_p3 = scmp.ge.s32.totalorder %s26_s17, 4   ;;  %s1019_s13 = smov %s701_s14 }
  0x9e   : > { %s1020_s14 = smov %s796_s26  ;;  %s1021_s15 = smov %s709_s16 }
  0x9f   : > { %s1022_s16 = smov %s1024_s20  ;;  %25 = sbr.rel (!%p23_p3) target bundleno = 10 (0xa), region = 107 }
  0xa6   :  { %340 = vsyncpa [#allocation3], 1 }
  0xa7   :  { %342 = vsyncpa [#allocation3 + $0x1], 1 }
  0xa8   :  { %343 = vsyncpa [#allocation6], 1 }
  0xa9   :  { %345 = vsyncpa [#allocation6 + $0x1], 1 }
  0xaa   :  { %346 = vsyncpa [#allocation4], 1 }
  0xab   :  { %348 = vsyncpa [#allocation4 + $0x1], 1 }
  0xac   :  { %349 = vsyncpa [#allocation9], 1 }
  0xad   :  { %351 = vsyncpa [#allocation9 + $0x1], 1 }

</bundles_post_ra>
